<compile_context>
chip_gen: v7x
topology: tpu7x:2x2x1
jax: 0.10.0
libtpu: 0.0.40
codegen_flags: <defaults>
</compile_context>

<pallas_src>
import jax
import jax.numpy as jnp
from jax.experimental import pallas as pl
from jax.experimental.pallas import tpu as pltpu

_MIB = 1024 * 1024


def _tpu_vmem_capacity_bytes():
    """Physical VMEM per TensorCore; conservative 64 MiB if the query fails."""
    try:
        info = pltpu.get_tpu_info()
        cap = int(getattr(info, "vmem_capacity_bytes", 0))
        if cap > 0:
            return cap
    except Exception:
        # Host-side hardware query only — this never wraps kernel compilation.
        pass
    return 64 * _MIB


def _row_tile(n_rows, row_in_bytes, row_out_bytes, budget, min_steps):
    """Largest row tile whose double-buffered tiles fit `budget` VMEM bytes."""
    per_row = 2 * 2 * row_in_bytes + 2 * row_out_bytes  # 2 inputs x 2 bufs + dbl-buffered out
    tm = max(8, budget // per_row)
    if min_steps > 1:
        tm = min(tm, pl.cdiv(n_rows, min_steps))
    if tm >= n_rows:
        return n_rows                       # single block == full dim (always legal)
    return max(8, (tm // 8) * 8)            # sublane-aligned partial blocks


def _ipd_packed_kernel(hd_ref, hm_ref, sel_ref, o_ref):
    """hd/hm: (tm, k*D) lane-dense tiles; sel: (k*D, k) group-sum matrix; o: (tm, k)."""
    prod = hd_ref[...].astype(jnp.float32) * hm_ref[...].astype(jnp.float32)   # VPU
    # Segmented reduction on the (otherwise idle) MXU: column g of `sel` sums
    # lanes [g*D, (g+1)*D).  Keeps data in its natural (tm, 128) layout.
    sums = jnp.dot(prod, sel_ref[...], preferred_element_type=jnp.float32)     # (tm, k)
    o_ref[...] = jax.nn.sigmoid(sums).astype(o_ref.dtype)                      # EUP


def _ipd_rowsum_kernel(hd_ref, hm_ref, o_ref):
    """General path. hd/hm: (tm, D) tiles; o: (tm, 1) f32 column."""
    prod = hd_ref[...].astype(jnp.float32) * hm_ref[...].astype(jnp.float32)
    s = jnp.sum(prod, axis=1, keepdims=True)                                   # f32 acc
    o_ref[...] = jax.nn.sigmoid(s).astype(o_ref.dtype)


def inner_product_decoder(h_diseases, h_mirnas):
    """Pallas equivalent of InnerProductDecoder.forward.

    Args:
      h_diseases: [N, D] float array (f32 or bf16).
      h_mirnas:   [N, D] float array (same shape/dtype).
    Returns:
      [N] float32 array: sigmoid(sum(h_diseases * h_mirnas, axis=1)).
    """
    assert h_diseases.shape == h_mirnas.shape
    assert h_diseases.dtype == h_mirnas.dtype
    N, D = h_diseases.shape
    itemsize = jnp.dtype(h_diseases.dtype).itemsize

    vmem_cap = _tpu_vmem_capacity_bytes()
    tile_budget = (vmem_cap * 5) // 8       # 128 MiB -> 80 MiB ; 64 MiB -> 40 MiB
    vmem_limit = (vmem_cap * 3) // 4        # 128 MiB -> 96 MiB ; 64 MiB -> 48 MiB
    # <=64 MiB parts are v7x-like (2 TensorCores/chip): keep >= 8 grid steps so
    # the "parallel" axis load-balances across cores; single-TC parts: no cap.
    min_steps = 8 if vmem_cap <= 64 * _MIB else 1

    compiler_params = pltpu.CompilerParams(
        dimension_semantics=("parallel",),
        vmem_limit_bytes=vmem_limit,
    )

    if 0 < D < 128 and 128 % D == 0:
        # -------- packed path: k rows per 128-lane VMEM row ------------------
        k = 128 // D
        n_pad = (-N) % k
        hd, hm = h_diseases, h_mirnas
        if n_pad:
            # Only when N % k != 0 (costs one extra pass to materialize the pad).
            hd = jnp.pad(hd, ((0, n_pad), (0, 0)))
            hm = jnp.pad(hm, ((0, n_pad), (0, 0)))
        n_rows = (N + n_pad) // k
        hd = hd.reshape(n_rows, k * D)      # free metadata reshape (row-major)
        hm = hm.reshape(n_rows, k * D)

        # Group-sum selection matrix: sel[d, g] = 1 iff d // D == g.
        sel = (jnp.arange(k * D)[:, None] // D ==
               jnp.arange(k)[None, :]).astype(jnp.float32)

        tm = _row_tile(n_rows, 128 * itemsize, k * 4, tile_budget, min_steps)
        grid = pl.cdiv(n_rows, tm)          # tail block clamped; no extra padding

        out = pl.pallas_call(
            _ipd_packed_kernel,
            out_shape=jax.ShapeDtypeStruct((n_rows, k), jnp.float32),
            grid_spec=pltpu.PrefetchScalarGridSpec(
                num_scalar_prefetch=0,
                grid=(grid,),
                in_specs=[
                    pl.BlockSpec((tm, k * D), lambda i: (i, 0)),
                    pl.BlockSpec((tm, k * D), lambda i: (i, 0)),
                    pl.BlockSpec((k * D, k), lambda i: (0, 0)),   # constant block
                ],
                out_specs=pl.BlockSpec((tm, k), lambda i: (i, 0)),
            ),
            compiler_params=compiler_params,
        )(hd, hm, sel)
        # Row-major flatten reproduces the original row order exactly.
        return out.reshape(-1)[:N]

    # -------- general path (D >= 128, or D does not divide 128) -------------
    # TODO(synk): add a D-axis ("arbitrary") reduction grid with a partial-sum
    # accumulator (pl.when init/finalize) for embeddings too wide for one tile.
    row_in_bytes = pl.cdiv(D, 128) * 128 * itemsize      # lane padding per row
    if 2 * 2 * 8 * row_in_bytes > tile_budget:
        raise ValueError(
            f"D={D} is too wide for a single-tile row reduction within the "
            f"{tile_budget // _MIB} MiB VMEM budget; D-tiling not implemented.")

    tm = _row_tile(N, row_in_bytes, 4, tile_budget, min_steps)
    grid = pl.cdiv(N, tm)

    out = pl.pallas_call(
        _ipd_rowsum_kernel,
        out_shape=jax.ShapeDtypeStruct((N, 1), jnp.float32),
        grid_spec=pltpu.PrefetchScalarGridSpec(
            num_scalar_prefetch=0,
            grid=(grid,),
            in_specs=[
                pl.BlockSpec((tm, D), lambda i: (i, 0)),
                pl.BlockSpec((tm, D), lambda i: (i, 0)),
            ],
            # Column output: always lowers; its HBM traffic (4 B/row) is <2% of
            # the >=1 KiB/row of input reads on this path, so it cannot bind.
            out_specs=pl.BlockSpec((tm, 1), lambda i: (i, 0)),
        ),
        compiler_params=compiler_params,
    )(h_diseases, h_mirnas)
    return out.reshape(-1)


if __name__ == "__main__":
    key = jax.random.PRNGKey(0)
    k1, k2, k3, k4, k5, k6 = jax.random.split(key, 6)

    # Shapes consistent with the forward: N (disease, mirna) pairs of
    # D-dimensional embeddings.  D=32 exercises the packed (lane-dense) path.
    N, D = 256, 32
    h_diseases = jax.random.normal(k1, (N, D), dtype=jnp.float32)
    h_mirnas = jax.random.normal(k2, (N, D), dtype=jnp.float32)
    out = inner_product_decoder(h_diseases, h_mirnas)
    jax.block_until_ready(out)
    ref = jax.nn.sigmoid(jnp.sum(h_diseases * h_mirnas, axis=1)).reshape(-1)
    assert out.shape == (N,)
    assert jnp.allclose(out, ref, atol=1e-5, rtol=1e-5)

    # N not a multiple of the row tile (exercises the clamped tail blocks).
    N2, D2 = 1000, 32
    h_d2 = jax.random.normal(k3, (N2, D2), dtype=jnp.float32)
    h_m2 = jax.random.normal(k4, (N2, D2), dtype=jnp.float32)
    out2 = inner_product_decoder(h_d2, h_m2)
    jax.block_until_ready(out2)
    ref2 = jax.nn.sigmoid(jnp.sum(h_d2 * h_m2, axis=1)).reshape(-1)
    assert out2.shape == (N2,)
    assert jnp.allclose(out2, ref2, atol=1e-5, rtol=1e-5)

    # D that does not divide 128 (exercises the general row-sum path).
    N3, D3 = 300, 200
    h_d3 = jax.random.normal(k5, (N3, D3), dtype=jnp.float32)
    h_m3 = jax.random.normal(k6, (N3, D3), dtype=jnp.float32)
    out3 = inner_product_decoder(h_d3, h_m3)
    jax.block_until_ready(out3)
    ref3 = jax.nn.sigmoid(jnp.sum(h_d3 * h_m3, axis=1)).reshape(-1)
    assert out3.shape == (N3,)
    assert jnp.allclose(out3, ref3, atol=1e-5, rtol=1e-5)

    print("KERNEL_OK")
</pallas_src>

<mosaic_0001>
module attributes {stable_mosaic.version = 11 : i64} {
  func.func @_ipd_packed_kernel(%arg0: i32, %arg1: memref<8x128xf32, #tpu.memory_space<vmem>>, %arg2: memref<8x128xf32, #tpu.memory_space<vmem>>, %arg3: memref<128x4xf32, #tpu.memory_space<vmem>>, %arg4: memref<8x4xf32, #tpu.memory_space<vmem>>) attributes {dimension_semantics = [#tpu.dimension_semantics<parallel>], iteration_bounds = array<i64: 8>, scalar_prefetch = 0 : i64, scratch_operands = 0 : i64, tpu.core_type = #tpu.core_type<tc>, window_params = [{transform_indices = @transform_0, window_bounds = array<i64: 8, 128>}, {transform_indices = @transform_1, window_bounds = array<i64: 8, 128>}, {pipeline_mode = #tpu.pipeline_mode<synchronous>, transform_indices = @transform_2, window_bounds = array<i64: 128, 4>}, {transform_indices = @transform_3, window_bounds = array<i64: 8, 4>}]} {
    %c0 = arith.constant 0 : index
    %c0_0 = arith.constant 0 : index
    %0 = vector.load %arg1[%c0, %c0_0] : memref<8x128xf32, #tpu.memory_space<vmem>>, vector<8x128xf32>
    %c0_1 = arith.constant 0 : index
    %c0_2 = arith.constant 0 : index
    %1 = vector.load %arg2[%c0_1, %c0_2] : memref<8x128xf32, #tpu.memory_space<vmem>>, vector<8x128xf32>
    %2 = arith.mulf %0, %1 : vector<8x128xf32>
    %c0_3 = arith.constant 0 : index
    %c0_4 = arith.constant 0 : index
    %3 = vector.load %arg3[%c0_3, %c0_4] : memref<128x4xf32, #tpu.memory_space<vmem>>, vector<128x4xf32>
    %cst = arith.constant dense<0.000000e+00> : vector<8x4xf32>
    %4 = tpu.matmul %2, %3, %cst {dimension_numbers = #tpu.dot_dimension_numbers<[1], [0], [0], [1], [0, 0, 1, 1], [], []>} : vector<8x128xf32>, vector<128x4xf32>, vector<8x4xf32> -> vector<8x4xf32>
    %5 = arith.negf %4 : vector<8x4xf32>
    %6 = math.exp %5 : vector<8x4xf32>
    %cst_5 = arith.constant 1.000000e+00 : f32
    %7 = vector.broadcast %cst_5 : f32 to vector<8x4xf32>
    %8 = arith.addf %7, %6 : vector<8x4xf32>
    %9 = arith.divf %7, %8 : vector<8x4xf32>
    %c0_6 = arith.constant 0 : index
    %c0_7 = arith.constant 0 : index
    %10 = vector.load %arg4[%c0_6, %c0_7] : memref<8x4xf32, #tpu.memory_space<vmem>>, vector<8x4xf32>
    tpu.vector_store %arg4[%c0_6, %c0_7], %9 {strides = array<i32>} : memref<8x4xf32, #tpu.memory_space<vmem>>, vector<8x4xf32>,
    return
  }
  func.func @transform_0(%arg0: i32) -> (i32, i32) {
    %c0_i32 = arith.constant 0 : i32
    %c0_i32_0 = arith.constant 0 : i32
    return %arg0, %c0_i32 : i32, i32
  }
  func.func @transform_1(%arg0: i32) -> (i32, i32) {
    %c0_i32 = arith.constant 0 : i32
    %c0_i32_0 = arith.constant 0 : i32
    return %arg0, %c0_i32 : i32, i32
  }
  func.func @transform_2(%arg0: i32) -> (i32, i32) {
    %c0_i32 = arith.constant 0 : i32
    %c0_i32_0 = arith.constant 0 : i32
    %c0_i32_1 = arith.constant 0 : i32
    return %c0_i32, %c0_i32_0 : i32, i32
  }
  func.func @transform_3(%arg0: i32) -> (i32, i32) {
    %c0_i32 = arith.constant 0 : i32
    %c0_i32_0 = arith.constant 0 : i32
    return %arg0, %c0_i32 : i32, i32
  }
}

</mosaic_0001>

<bundles_post_ra>
// kernel: tpu_custom_call.1
= control target key start
LH: loop header
LB: loop body
LE: loop exit
PB: predicated region body
PF: predicated region fallthrough
CT: control target
= control target key end

     0   :  { %s478_s12 = smov 0   ;;  %s550_s0 = inlined_call_operand.vmem [shape: f32[64,128], index: 0, kind: input, shape index: {}]   ;;  %s551_s1 = inlined_call_operand.vmem [shape: f32[64,128], index: 1, kind: input, shape index: {}]   ;;  %s552_s2 = inlined_call_operand.vmem [shape: f32[128,4], index: 2, kind: input, shape index: {}]   ;;  %s553_s3 = inlined_call_operand.vmem [shape: f32[64,4], index: 3, kind: output, shape index: {}]  }
   0x1 LB: > { %s345_s13 = sadd.s32 4294967295, %s453_s12   ;;  %p349_p0 = scmp.ge.s32.totalorder %s453_s12, 1  ;;  %s453_s12 = sphi %s478_s12, %s13_s12  }
   0x2   : > { %p145_p1 = scmp.lt.s32.totalorder %s453_s12, 9 }
   0x4   : > { %p146_p2 = pnand %p349_p0, %p145_p1 }
   0x5   : > { %v186_v0 = vld [vmem:[%s552_s2] sm:$0xff] (!%p146_p2)  ;;  %v187_v1 = vld [vmem:[%s552_s2 + $0x8] sm:$0xff] (!%p146_p2)  ;;  %v188_v2 = vld [vmem:[%s552_s2 + $0x10] sm:$0xff] (!%p146_p2)  ;;  %v455_v3 = vmov (!%p146_p2), 0.0|0.0   ;;  %vm456_vm0 = vmmov (!%p146_p2), 0   ;;  %v457_v6 = vmov (!%p146_p2), 0.0  }
   0x6   : > { %149 = sbr.rel (%p146_p2) target bundleno = 278 (0x116), region = 32  ;;  %408 = vmatprep.subr.bf16.mxu0 (!%p146_p2), %v455_v3  ;;  %v409_v4 = vpack.c.bf16 (!%p146_p2), %v187_v1, %v186_v0  ;;  %v189_v5 = vld [vmem:[%s552_s2 + $0x18] sm:$0xff] (!%p146_p2)  ;;  %405 = vmatprep.mubr.msk.f32.mxu0 (!%p146_p2), %vm456_vm0, %v457_v6  ;;  %v190_v8 = vld [vmem:[%s552_s2 + $0x20] sm:$0xff] (!%p146_p2)  ;;  %v191_v9 = vld [vmem:[%s552_s2 + $0x28] sm:$0xff] (!%p146_p2)  ;;  %p171_p3 = scmp.lt.s32.totalorder (!%p146_p2), %s345_s13, 7  ;;  %vm278_vm1 = vcmask (!%p146_p2), 31744  }
   0x7   : > { %v412_v7 = vpack.c.bf16 (!%p146_p2), %v189_v5, %v188_v2  ;;  %v415_v10 = vpack.c.bf16 (!%p146_p2), %v191_v9, %v190_v8  ;;  %v192_v11 = vld [vmem:[%s552_s2 + $0x30] sm:$0xff] (!%p146_p2)  ;;  %v193_v12 = vld [vmem:[%s552_s2 + $0x38] sm:$0xff] (!%p146_p2)  ;;  %v194_v14 = vld [vmem:[%s552_s2 + $0x40] sm:$0xff] (!%p146_p2) }
   0x8   : > { %410 = vmatpush3.bf16.msra.mxu0 (!%p146_p2), %v409_v4  ;;  %v418_v13 = vpack.c.bf16 (!%p146_p2), %v193_v12, %v192_v11  ;;  %v195_v15 = vld [vmem:[%s552_s2 + $0x48] sm:$0xff] (!%p146_p2)  ;;  %v196_v17 = vld [vmem:[%s552_s2 + $0x50] sm:$0xff] (!%p146_p2)  ;;  %v197_v18 = vld [vmem:[%s552_s2 + $0x58] sm:$0xff] (!%p146_p2) }
   0x9   : > { %411 = vmatprep.subr.bf16.mxu0 (!%p146_p2), %v455_v3  ;;  %v421_v16 = vpack.c.bf16 (!%p146_p2), %v195_v15, %v194_v14  ;;  %v424_v19 = vpack.c.bf16 (!%p146_p2), %v197_v18, %v196_v17  ;;  %v198_v20 = vld [vmem:[%s552_s2 + $0x60] sm:$0xff] (!%p146_p2)  ;;  %v199_v21 = vld [vmem:[%s552_s2 + $0x68] sm:$0xff] (!%p146_p2)  ;;  %v200_v23 = vld [vmem:[%s552_s2 + $0x70] sm:$0xff] (!%p146_p2) }
   0xa   : > { %v427_v22 = vpack.c.bf16 (!%p146_p2), %v199_v21, %v198_v20  ;;  %v201_v24 = vld [vmem:[%s552_s2 + $0x78] sm:$0xff] (!%p146_p2) }
   0xb   : > { %v430_v25 = vpack.c.bf16 (!%p146_p2), %v201_v24, %v200_v23 }
   0xc   : > { %413 = vmatpush3.bf16.msra.mxu0 (!%p146_p2), %v412_v7 }
   0xd   : > { %414 = vmatprep.subr.bf16.mxu0 %v455_v3  ;;  %s555_s13 = smov (!%p171_p3, %s345_s13), 7 }
   0xe   : > { %s350_s17 = sshll.u32 %s555_s13, 3 }
   0xf   : > { %s174_s24 = scalar_lea.vmem %s550_s0, %s350_s17  ;;  %s178_s27 = scalar_lea.vmem %s551_s1, %s350_s17 }
  0x10   : > { %416 = vmatpush3.bf16.msra.mxu0 %v415_v10  ;;  %v183_v26 = vld [vmem:[%s174_s24] sm:$0xff]  ;;  %s182_s29 = scalar_lea.vmem %s553_s3, %s350_s17 }
  0x11   : > { %417 = vmatprep.subr.bf16.mxu0 %v455_v3  ;;  %v184_v27 = vld [vmem:[%s178_s27] sm:$0xff] }
  0x12   : > { %v185_v28 = vmul.f32 %v184_v27, %v183_v26 }
  0x14   : > { %419 = vmatpush3.bf16.msra.mxu0 %v418_v13 }
  0x15   : > { %420 = vmatprep.subr.bf16.mxu0 %v455_v3 }
  0x18   : > { %422 = vmatpush3.bf16.msra.mxu0 %v421_v16 }
  0x19   : > { %423 = vmatprep.subr.bf16.mxu0 %v455_v3 }
  0x1c   : > { %425 = vmatpush3.bf16.msra.mxu0 %v424_v19 }
  0x1d   : > { %426 = vmatprep.subr.bf16.mxu0 %v455_v3 }
  0x20   : > { %428 = vmatpush3.bf16.msra.mxu0 %v427_v22 }
  0x21   : > { %429 = vmatprep.subr.bf16.mxu0 %v455_v3 }
  0x24   : > { %431 = vmatpush3.bf16.msra.mxu0 %v430_v25 }
  0x27   : > { %406 = vmatmul.mubr.f32.vlgmr.msra.gmra.mrb[0].mxu0 %v185_v28 }
  0xfa   : > { %v268_v29 = vpop.f32.mrb[0].mxu0 }
  0xfb   : > { %v353_v30 = vmul.f32 -1.442695, %v268_v29  ;;  %v407_v31 = vpop.f32.mrb[1].mxu0 }
  0xfd   : > { %443 = vpow2.f32 %v353_v30 }
 0x107   : > { %v444_v32 = vpop.eup %443 }
 0x108   : > { %v275_v33 = vadd.f32 1.0, %v444_v32 }
 0x10a   : > { %445 = vrcp.f32 %v275_v33 }
 0x114   : > { %v446_v34 = vpop.eup %445 }
 0x115   : > { %279 = vst.msk [vmem:[%s182_s29] sm:$0xff] %vm278_vm1, %v446_v34 }
 0x116 PF: > { %s13_s12 = sadd.s32 1, %s453_s12  }
 0x117   : > { %p10_p4 = scmp.ge.s32.totalorder %s13_s12, 10  }
 0x119   :  { %12 = sbr.rel (!%p10_p4) target bundleno = 1 (0x1), region = 65 }

</bundles_post_ra>
